<compile_context>
chip_gen: v5e
topology: v5e:2x2
jax: 0.10.0
libtpu: 0.0.40
codegen_flags: <defaults>
</compile_context>

<pallas_src>
import jax
import jax.numpy as jnp
from jax.experimental import pallas as pl
from jax.experimental.pallas import tpu as pltpu


# ----------------------------------------------------------------------------
# small helpers
# ----------------------------------------------------------------------------
def _round_up(n, m):
    return ((n + m - 1) // m) * m


def _vmem_limit(nbytes):
    # Explicit scoped-VMEM budget with headroom; never below the 32 MiB
    # default so tiny kernels are unaffected.  (Review: re-derive for v7x.)
    return int(max(32 * 1024 * 1024, (nbytes * 3) // 2))


def _resident_spec(block_shape, index_map):
    """BlockSpec for an operand that is identical at every grid step: keep a
    single VMEM copy instead of the default double buffer (review item).
    Falls back to a plain BlockSpec if this jax build lacks pipeline_mode."""
    try:
        return pl.BlockSpec(block_shape, index_map,
                            pipeline_mode=pl.Buffered(1))
    except Exception:  # pragma: no cover - older jax without pipeline_mode
        return pl.BlockSpec(block_shape, index_map)


# ----------------------------------------------------------------------------
# Kernel A: hoisted input projection (parallel grid, one big MXU matmul).
#   pre = x @ [W_ih_f^T | W_ih_b^T] + [b_ih_f + b_hh_f | b_ih_b + b_hh_b]
# ----------------------------------------------------------------------------
def _proj_kernel(x_ref, w_ref, b_ref, o_ref):
    o_ref[...] = (
        jnp.dot(x_ref[...], w_ref[...], preferred_element_type=jnp.float32)
        + b_ref[...])


def _input_projection(x2d, w_cat_t, b_cat, *, row_block=256):
    """x2d: (N, D) time-major flattened input.  Returns (N, 8H) f32."""
    N, D = x2d.shape
    G = w_cat_t.shape[1]                       # 8H  ([fwd 4H | bwd 4H])
    rb = min(row_block, _round_up(N, 8))
    n_pad = _round_up(N, rb)                   # pad instead of a full-extent
    if n_pad != N:                             # fallback block (review item)
        x2d = jnp.pad(x2d, ((0, n_pad - N), (0, 0)))

    esz = x2d.dtype.itemsize
    est = (2 * rb * D * esz                    # double-buffered input rows
           + 2 * G * (D + 1) * w_cat_t.dtype.itemsize   # weights (conservative)
           + 2 * rb * G * 4)                   # double-buffered output rows

    out = pl.pallas_call(
        _proj_kernel,
        out_shape=jax.ShapeDtypeStruct((n_pad, G), jnp.float32),
        grid_spec=pltpu.PrefetchScalarGridSpec(
            num_scalar_prefetch=0,
            grid=(n_pad // rb,),
            in_specs=[
                pl.BlockSpec((rb, D), lambda i: (i, 0)),   # x rows
                _resident_spec((D, G), lambda i: (0, 0)),  # fused W_ih^T
                _resident_spec((1, G), lambda i: (0, 0)),  # fused bias
            ],
            out_specs=pl.BlockSpec((rb, G), lambda i: (i, 0)),
        ),
        compiler_params=pltpu.CompilerParams(
            dimension_semantics=("parallel",),
            vmem_limit_bytes=_vmem_limit(est)),
    )(x2d, w_cat_t, b_cat)
    return out[:N]


# ----------------------------------------------------------------------------
# Kernel B: fused bidirectional LSTM recurrence + FC head, time-chunked.
#   pre_ref : (tb, B, 8H) gate-interleaved, backward half pre-reversed in time
#   wblk_ref: (2H, 8H) block-diagonal recurrent weight (gate-interleaved)
#   wfc_ref : (1, 2H)  fc weight over [h_fwd | h_bwd]
#   qf/qb   : (B, tb) lane-dense per-chunk outputs (q = h . w_fc per direction)
# ----------------------------------------------------------------------------
def _bilstm_fc_kernel(pre_ref, wblk_ref, wfc_ref, qf_ref, qb_ref,
                      h_scr, c_scr):
    chunk = pl.program_id(0)

    @pl.when(chunk == 0)
    def _():
        h_scr[...] = jnp.zeros_like(h_scr)
        c_scr[...] = jnp.zeros_like(c_scr)

    TB = pre_ref.shape[0]              # timesteps in this chunk
    B = h_scr.shape[0]
    H2 = h_scr.shape[-1]               # 2H  ([fwd H | bwd H])
    H = H2 // 2

    w_blk = wblk_ref[...]              # resident across the whole grid
    w_fc = wfc_ref[...]
    # hoisted out of the loop (broadcast ops are not CSE'd by JAX)
    lane = jax.lax.broadcasted_iota(jnp.int32, (1, TB), 1)

    def step(j, carry):
        h, c, qf_acc, qb_acc = carry
        # ONE fused MXU call for both directions per timestep.
        gates = pre_ref[j] + jnp.dot(h, w_blk,
                                     preferred_element_type=jnp.float32)
        # gate-interleaved layout: each 2H-slice holds [fwd | bwd] halves.
        # NOTE: slices are 128-lane aligned whenever H % 64 == 0 (module
        # default H=256); tiny test H is unaligned but correct.
        i_g = jax.nn.sigmoid(gates[:, 0 * H2:1 * H2])
        f_g = jax.nn.sigmoid(gates[:, 1 * H2:2 * H2])
        g_g = jnp.tanh(gates[:, 2 * H2:3 * H2])
        o_g = jax.nn.sigmoid(gates[:, 3 * H2:4 * H2])
        c = f_g * c + i_g * g_g
        h = o_g * jnp.tanh(c)
        # fused FC head: VPU multiply + lane reductions (no MXU, no HBM h).
        prod = h * w_fc
        qf_col = jnp.sum(prod[:, :H], axis=-1, keepdims=True)   # (B, 1)
        qb_col = jnp.sum(prod[:, H:], axis=-1, keepdims=True)
        # lane-dense accumulation: place this step's scalar at lane j.
        sel = lane == j
        qf_acc = jnp.where(sel, qf_col, qf_acc)
        qb_acc = jnp.where(sel, qb_col, qb_acc)
        return h, c, qf_acc, qb_acc

    carry0 = (h_scr[...], c_scr[...],
              jnp.zeros((B, TB), jnp.float32),
              jnp.zeros((B, TB), jnp.float32))
    h, c, qf_acc, qb_acc = jax.lax.fori_loop(
        0, TB, step, carry0, unroll=(4 if TB % 4 == 0 else 1))

    # persist recurrent state for the next chunk
    h_scr[...] = h
    c_scr[...] = c
    # single lane-dense store per chunk (review item: no last-dim-1 stores)
    qf_ref[...] = qf_acc
    qb_ref[...] = qb_acc


def _bilstm_fc(pre_cat, w_blk, w_fc, *, time_block=64):
    # TODO(synk): on v7x the two directions could be split across the 2
    # TensorCores instead of fused into one MXU call; kept fused here since it
    # is the portable win on v5e/v6e.
    T, B, GC = pre_cat.shape           # GC = 8H, gate-interleaved
    H2 = w_blk.shape[0]                # 2H
    tb = min(time_block, _round_up(T, 8))
    nc = pl.cdiv(T, tb)
    t_pad = nc * tb
    if t_pad != T:
        # Padding is harmless: both directions consume real data first (the
        # backward stream is pre-reversed), so padded steps only produce
        # outputs that are sliced away in the wrapper.
        pre_cat = jnp.pad(pre_cat, ((0, t_pad - T), (0, 0), (0, 0)))

    est = (2 * tb * B * GC * 4          # double-buffered pre chunks
           + 2 * (H2 * GC + H2) * 4     # resident weights (conservative x2)
           + 2 * 2 * B * tb * 4         # q output blocks
           + 2 * B * H2 * 4)            # carry scratch

    qf, qb = pl.pallas_call(
        _bilstm_fc_kernel,
        out_shape=(jax.ShapeDtypeStruct((nc, B, tb), jnp.float32),
                   jax.ShapeDtypeStruct((nc, B, tb), jnp.float32)),
        grid_spec=pltpu.PrefetchScalarGridSpec(
            num_scalar_prefetch=0,
            grid=(nc,),
            in_specs=[
                pl.BlockSpec((tb, B, GC), lambda c: (c, 0, 0)),
                _resident_spec((H2, GC), lambda c: (0, 0)),   # W_blk
                _resident_spec((1, H2), lambda c: (0, 0)),    # w_fc
            ],
            out_specs=[
                pl.BlockSpec((None, B, tb), lambda c: (c, 0, 0)),
                pl.BlockSpec((None, B, tb), lambda c: (c, 0, 0)),
            ],
            scratch_shapes=[
                pltpu.VMEM((B, H2), jnp.float32),   # h carry [fwd | bwd]
                pltpu.VMEM((B, H2), jnp.float32),   # c carry [fwd | bwd]
            ],
        ),
        compiler_params=pltpu.CompilerParams(
            dimension_semantics=("arbitrary",),     # sequential recurrence
            vmem_limit_bytes=_vmem_limit(est)),
    )(pre_cat, w_blk, w_fc)
    return qf, qb, t_pad


# ----------------------------------------------------------------------------
# DSN forward (bidirectional LSTM + fc + sigmoid)
# ----------------------------------------------------------------------------
def dsn_forward(x, params, *, matmul_dtype=jnp.float32,
                row_block=256, time_block=64):
    """x: (B, T, in_dim) f32 -> p: (B, T, 1) f32.

    matmul_dtype=jnp.bfloat16 runs the (dominant) input projection on the
    bf16 MXU path (v6e/v7x); the recurrence carries stay f32.
    """
    B, T, D = x.shape
    H = params["w_hh_f"].shape[1]
    G4 = 4 * H

    # --- hoisted input projection: both directions fused into one matmul ---
    # TODO(synk): the (B,T,D)->(T,B,D) transpose could be folded into the
    # projection kernel's index_map to save one HBM pass over x (mainly v5e).
    x2d = jnp.transpose(x, (1, 0, 2)).reshape(T * B, D)
    w_ih_cat = jnp.concatenate([params["w_ih_f"].T, params["w_ih_b"].T], axis=1)
    b_cat = jnp.concatenate([params["b_ih_f"] + params["b_hh_f"],
                             params["b_ih_b"] + params["b_hh_b"]]).reshape(1, -1)
    if matmul_dtype != jnp.float32:
        x2d = x2d.astype(matmul_dtype)
        w_ih_cat = w_ih_cat.astype(matmul_dtype)

    pre = _input_projection(x2d, w_ih_cat, b_cat, row_block=row_block)
    pre = pre.reshape(T, B, 2 * G4)            # [fwd 4H | bwd 4H]

    # --- pack operands for the recurrence kernel (cheap XLA, one-time) -----
    # backward half is time-reversed so both directions walk ascending time.
    pre_f = pre[..., :G4].reshape(T, B, 4, H)
    pre_b = pre[::-1, :, G4:].reshape(T, B, 4, H)
    # gate-interleave: columns [i_f i_b | f_f f_b | g_f g_b | o_f o_b]
    pre_cat = jnp.stack([pre_f, pre_b], axis=3).reshape(T, B, 8 * H)

    # block-diagonal recurrent weight in the same gate-interleaved layout.
    wf = params["w_hh_f"].T.reshape(H, 4, H)
    wb = params["w_hh_b"].T.reshape(H, 4, H)
    zeros = jnp.zeros((H, 4, H), jnp.float32)
    top = jnp.stack([wf, zeros], axis=2).reshape(H, 8 * H)   # rows for h_fwd
    bot = jnp.stack([zeros, wb], axis=2).reshape(H, 8 * H)   # rows for h_bwd
    w_blk = jnp.concatenate([top, bot], axis=0)              # (2H, 8H)

    qf, qb, t_pad = _bilstm_fc(pre_cat, w_blk, params["w_fc"],
                               time_block=time_block)

    # --- tiny (B, T) epilogue in XLA ----------------------------------------
    qf_bt = jnp.transpose(qf, (1, 0, 2)).reshape(B, t_pad)[:, :T]
    qb_bt = jnp.transpose(qb, (1, 0, 2)).reshape(B, t_pad)[:, :T][:, ::-1]
    p = jax.nn.sigmoid(qf_bt + qb_bt + params["b_fc"].reshape(1, 1))
    return p[:, :, None]                                      # (B, T, 1)


# ----------------------------------------------------------------------------
# Pure-JAX reference (mirrors PyTorch nn.LSTM semantics, gate order i,f,g,o)
# ----------------------------------------------------------------------------
def _lstm_ref_dir(x, w_ih, w_hh, b_ih, b_hh, reverse):
    B, T, D = x.shape
    H = w_hh.shape[1]

    def step(carry, x_t):
        h, c = carry
        gates = x_t @ w_ih.T + b_ih + h @ w_hh.T + b_hh
        i, f, g, o = jnp.split(gates, 4, axis=-1)
        i, f, o = jax.nn.sigmoid(i), jax.nn.sigmoid(f), jax.nn.sigmoid(o)
        g = jnp.tanh(g)
        c = f * c + i * g
        h = o * jnp.tanh(c)
        return (h, c), h

    xs = jnp.transpose(x, (1, 0, 2))
    if reverse:
        xs = xs[::-1]
    (_, _), hs = jax.lax.scan(step, (jnp.zeros((B, H)), jnp.zeros((B, H))), xs)
    if reverse:
        hs = hs[::-1]
    return jnp.transpose(hs, (1, 0, 2))


def dsn_ref(x, params):
    hf = _lstm_ref_dir(x, params["w_ih_f"], params["w_hh_f"],
                       params["b_ih_f"], params["b_hh_f"], reverse=False)
    hb = _lstm_ref_dir(x, params["w_ih_b"], params["w_hh_b"],
                       params["b_ih_b"], params["b_hh_b"], reverse=True)
    h = jnp.concatenate([hf, hb], axis=-1)
    return jax.nn.sigmoid(h @ params["w_fc"].T + params["b_fc"])


# ----------------------------------------------------------------------------
def init_params(key, in_dim, hid_dim):
    """Deterministic init mimicking PyTorch's uniform(-1/sqrt(H), 1/sqrt(H))."""
    k = 1.0 / jnp.sqrt(jnp.float32(hid_dim))
    ks = jax.random.split(key, 10)
    u = lambda kk, shape: jax.random.uniform(kk, shape, jnp.float32, -k, k)
    return {
        # forward direction
        "w_ih_f": u(ks[0], (4 * hid_dim, in_dim)),
        "w_hh_f": u(ks[1], (4 * hid_dim, hid_dim)),
        "b_ih_f": u(ks[2], (4 * hid_dim,)),
        "b_hh_f": u(ks[3], (4 * hid_dim,)),
        # reverse direction
        "w_ih_b": u(ks[4], (4 * hid_dim, in_dim)),
        "w_hh_b": u(ks[5], (4 * hid_dim, hid_dim)),
        "b_ih_b": u(ks[6], (4 * hid_dim,)),
        "b_hh_b": u(ks[7], (4 * hid_dim,)),
        # fc head
        "w_fc": u(ks[8], (1, 2 * hid_dim)),
        "b_fc": u(ks[9], (1,)),
    }


if __name__ == "__main__":
    # T=10 deliberately exercises the time/row padding paths.
    B, T, IN_DIM, HID_DIM = 2, 10, 32, 16

    key = jax.random.PRNGKey(0)
    k_x, k_p = jax.random.split(key)
    x = jax.random.normal(k_x, (B, T, IN_DIM), dtype=jnp.float32)
    params = init_params(k_p, IN_DIM, HID_DIM)

    p = jax.block_until_ready(dsn_forward(x, params))
    p_ref = jax.block_until_ready(dsn_ref(x, params))

    assert p.shape == (B, T, 1), p.shape
    assert jnp.allclose(p, p_ref, atol=1e-4, rtol=1e-4), (
        float(jnp.max(jnp.abs(p - p_ref))))

    # bf16 MXU path for the projection (v6e/v7x win); looser tolerance.
    p_bf16 = jax.block_until_ready(
        dsn_forward(x, params, matmul_dtype=jnp.bfloat16))
    assert jnp.allclose(p_bf16, p_ref, atol=5e-2, rtol=5e-2), (
        float(jnp.max(jnp.abs(p_bf16 - p_ref))))

    print("KERNEL_OK")
</pallas_src>

<mosaic_0001>
module attributes {stable_mosaic.version = 11 : i64} {
  func.func @_proj_kernel(%arg0: i32, %arg1: memref<24x32xf32, #tpu.memory_space<vmem>>, %arg2: memref<32x128xf32, #tpu.memory_space<vmem>>, %arg3: memref<1x128xf32, #tpu.memory_space<vmem>>, %arg4: memref<24x128xf32, #tpu.memory_space<vmem>>) attributes {dimension_semantics = [#tpu.dimension_semantics<parallel>], iteration_bounds = array<i64: 1>, scalar_prefetch = 0 : i64, scratch_operands = 0 : i64, tpu.core_type = #tpu.core_type<tc>, window_params = [{transform_indices = @transform_0, window_bounds = array<i64: 24, 32>}, {pipeline_mode = #tpu.pipeline_mode<synchronous>, transform_indices = @transform_1, window_bounds = array<i64: 32, 128>}, {pipeline_mode = #tpu.pipeline_mode<synchronous>, transform_indices = @transform_2, window_bounds = array<i64: 1, 128>}, {transform_indices = @transform_3, window_bounds = array<i64: 24, 128>}]} {
    %c0 = arith.constant 0 : index
    %c0_0 = arith.constant 0 : index
    %0 = vector.load %arg1[%c0, %c0_0] : memref<24x32xf32, #tpu.memory_space<vmem>>, vector<24x32xf32>
    %c0_1 = arith.constant 0 : index
    %c0_2 = arith.constant 0 : index
    %1 = vector.load %arg2[%c0_1, %c0_2] : memref<32x128xf32, #tpu.memory_space<vmem>>, vector<32x128xf32>
    %cst = arith.constant dense<0.000000e+00> : vector<24x128xf32>
    %2 = tpu.matmul %0, %1, %cst {dimension_numbers = #tpu.dot_dimension_numbers<[1], [0], [0], [1], [0, 0, 1, 1], [], []>} : vector<24x32xf32>, vector<32x128xf32>, vector<24x128xf32> -> vector<24x128xf32>
    %c0_3 = arith.constant 0 : index
    %c0_4 = arith.constant 0 : index
    %3 = vector.load %arg3[%c0_3, %c0_4] : memref<1x128xf32, #tpu.memory_space<vmem>>, vector<1x128xf32>
    %4 = vector.broadcast %3 : vector<1x128xf32> to vector<24x128xf32>
    %5 = arith.addf %2, %4 : vector<24x128xf32>
    %c0_5 = arith.constant 0 : index
    %c0_6 = arith.constant 0 : index
    %6 = vector.load %arg4[%c0_5, %c0_6] : memref<24x128xf32, #tpu.memory_space<vmem>>, vector<24x128xf32>
    tpu.vector_store %arg4[%c0_5, %c0_6], %5 {strides = array<i32>} : memref<24x128xf32, #tpu.memory_space<vmem>>, vector<24x128xf32>,
    return
  }
  func.func @transform_0(%arg0: i32) -> (i32, i32) {
    %c0_i32 = arith.constant 0 : i32
    %c0_i32_0 = arith.constant 0 : i32
    return %arg0, %c0_i32 : i32, i32
  }
  func.func @transform_1(%arg0: i32) -> (i32, i32) {
    %c0_i32 = arith.constant 0 : i32
    %c0_i32_0 = arith.constant 0 : i32
    %c0_i32_1 = arith.constant 0 : i32
    return %c0_i32, %c0_i32_0 : i32, i32
  }
  func.func @transform_2(%arg0: i32) -> (i32, i32) {
    %c0_i32 = arith.constant 0 : i32
    %c0_i32_0 = arith.constant 0 : i32
    %c0_i32_1 = arith.constant 0 : i32
    return %c0_i32, %c0_i32_0 : i32, i32
  }
  func.func @transform_3(%arg0: i32) -> (i32, i32) {
    %c0_i32 = arith.constant 0 : i32
    %c0_i32_0 = arith.constant 0 : i32
    return %arg0, %c0_i32 : i32, i32
  }
}

</mosaic_0001>

<bundles_post_ra>
// kernel: tpu_custom_call.1
= control target key start
LH: loop header
LB: loop body
LE: loop exit
PB: predicated region body
PF: predicated region fallthrough
CT: control target
= control target key end

     0   :  { %8 = vsyncpa [#allocation3], 0  ;;  %s258_s0 = inlined_call_operand.hbm [shape: f32[24,32], index: 0, kind: input, shape index: {}]   ;;  %s259_s1 = inlined_call_operand.hbm [shape: f32[32,128], index: 1, kind: input, shape index: {}]   ;;  %s260_s2 = inlined_call_operand.vmem [shape: f32[1,128], index: 2, kind: input, shape index: {}]   ;;  %s261_s3 = inlined_call_operand.hbm [shape: f32[24,128], index: 3, kind: output, shape index: {}]  }
   0x1   :  { %9 = vsyncpa [#allocation6], 0 }
   0x2   :  { %10 = vsyncpa [#allocation4], 0  ;;  %s15_s14 = sshll.u32 %s258_s0, 4  ;;  %s212_s15 = smov [#allocation2]   ;;  %s16_s14 = int_to_ptr.hbm [resolvable:$true] %s15_s14 }
   0x3   :  { %s17_s16 = sshll.u32 %s212_s15, 4  ;;  %s28_s19 = sshll.u32 %s259_s1, 4  ;;  %s18_s16 = int_to_ptr.vmem [resolvable:$true] %s17_s16  ;;  %s29_s19 = int_to_ptr.hbm [resolvable:$true] %s28_s19 }
   0x4   :  { %s213_s20 = smov 128   ;;  %s214_s21 = smov 8  }
   0x5   :  { %23 = dma.hbm_to_vmem [thread:$0]  %s16_s14, 384, %s18_s16, [#allocation3], %s213_s20, %s213_s20, %s214_s21  }
   0x6   :  { %s215_s22 = smov [#allocation5]  }
   0x7   :  { %s30_s23 = sshll.u32 %s215_s22, 4  ;;  %s31_s23 = int_to_ptr.vmem [resolvable:$true] %s30_s23 }
   0x8   :  { %36 = dma.hbm_to_vmem [thread:$0]  %s29_s19, 512, %s31_s23, [#allocation6], %s213_s20, %s213_s20, %s214_s21  }
   0x9   :  { %206 = dma.done.wait [#allocation3], 384  }
   0xa   :  { %207 = vsyncadd [#allocation3], 4294966912 }
   0xb   :  { %208 = dma.done.wait [#allocation6], 512  }
   0xc   :  { %209 = vsyncadd [#allocation6], 4294966784  ;;  %v53_v0 = vld [vmem:[#allocation5 + $0x18] sm:$0xff]  ;;  %v52_v1 = vld [vmem:[#allocation5 + $0x10] sm:$0xff]  ;;  %vm58_vm0 = vcmask 261120   ;;  %s216_s24 = smov [#allocation7]  }
   0xd   :  { %121 = vmatpush.msra.mxu2 %v53_v0  ;;  %80 = vmatpush.msra.mxu0 %v53_v0  ;;  %v51_v2 = vld [vmem:[#allocation5 + $0x8] sm:$0xff]  ;;  %v50_v3 = vld [vmem:[#allocation5] sm:$0xff]  ;;  %v49_v4 = vld [vmem:[#allocation2 + $0x10] sm:$0xff]  ;;  %s101_s25 = sshll.u32 %s216_s24, 4  ;;  %s103_s28 = sshll.u32 %s261_s3, 4  ;;  %s102_s25 = int_to_ptr.vmem [resolvable:$true] %s101_s25  ;;  %s104_s28 = int_to_ptr.hbm [resolvable:$true] %s103_s28 }
   0xe   :  { %120 = vmatpush.msra.mxu1 %v53_v0  ;;  %v47_v5 = vld [vmem:[#allocation2] sm:$0xff]  ;;  %v48_v6 = vld [vmem:[#allocation2 + $0x8] sm:$0xff] }
   0xf   :  { %123 = vmatpush.msra.mxu2 %v52_v1  ;;  %81 = vmatpush.msra.mxu0 %v52_v1  ;;  %v133_v7 = vld [vmem:[%s260_s2] ss:$0 sm:$0xff] }
  0x10   :  { %122 = vmatpush.msra.mxu1 %v52_v1 }
  0x11   :  { %125 = vmatpush.msra.mxu2 %v51_v2  ;;  %82 = vmatpush.msra.mxu0 %v51_v2 }
  0x12   :  { %124 = vmatpush.msra.mxu1 %v51_v2 }
  0x13   :  { %127 = vmatpush.msra.mxu2 %v50_v3  ;;  %83 = vmatpush.msra.mxu0 %v50_v3 }
  0x14   :  { %119 = vmatmul.msk.f32.vlgmr.msra.gmra.mxu2 %vm58_vm0, %v49_v4  ;;  %126 = vmatpush.msra.mxu1 %v50_v3 }
  0x15   :  { %117 = vmatmul.msk.f32.vlgmr.msra.gmra.mxu0 %vm58_vm0, %v47_v5  ;;  %118 = vmatmul.msk.f32.vlgmr.msra.gmra.mxu1 %vm58_vm0, %v48_v6 }
  0x92   :  { %v85_v8 = vpop.f32.mrf.mxu0  ;;  %v88_v9 = vpop.f32.mrf.mxu1 }
  0x93   :  { %v86_v10 = vadd.f32 %v133_v7, %v85_v8  ;;  %v89_v11 = vadd.f32 %v133_v7, %v88_v9 }
  0x95   :  { %94 = vst [vmem:[#allocation7] sm:$0xff] %v86_v10 }
  0x96   :  { %95 = vst [vmem:[#allocation7 + $0x8] sm:$0xff] %v89_v11 }
  0x97   :  { %v91_v12 = vpop.f32.mrf.mxu2 }
  0x98   :  { %v92_v13 = vadd.f32 %v133_v7, %v91_v12 }
  0x9a   :  { %96 = vst [vmem:[#allocation7 + $0x10] sm:$0xff] %v92_v13 }
  0x9b   :  { %109 = dma.vmem_to_hbm [thread:$0]  %s102_s25, 384, %s104_s28, [#allocation4], %s213_s20, %s213_s20, %s214_s21  }
  0x9c   :  { %210 = dma.done.wait [#allocation4], 384  }
  0x9d   :  { %211 = vsyncadd [#allocation4], 4294966912 }
  0x9e   :  { %114 = vsyncpa [#allocation3], 1 }
  0x9f   :  { %115 = vsyncpa [#allocation6], 1 }
  0xa0   :  { %116 = vsyncpa [#allocation4], 1 }

</bundles_post_ra>
